<compile_context>
chip_gen: v6e
topology: v6e:2x2x1
jax: 0.10.0
libtpu: 0.0.40
codegen_flags: <defaults>
</compile_context>

<pallas_src>
import functools

import jax
import jax.numpy as jnp
from jax.experimental import pallas as pl
from jax.experimental.pallas import tpu as pltpu


def _rda_kernel(rvec_ref, onehot_ref, seq_ref, tgt_ref, tv_ref, valid_ref,
                ctx_ref, ta_ref, *, include_val, n_relation, mxu_dtype):
    """One grid step: a block of Bb batch elements, all T targets x R relations."""
    f32 = jnp.float32
    R = n_relation

    seq = seq_ref[...].astype(f32)          # (Bb, H, V)
    tgt = tgt_ref[...].astype(f32)          # (Bb, T, V)
    tv = tv_ref[...].astype(f32)            # (Bb, T*R, V)  target_value, (t,r) flattened
    rvec = rvec_ref[...].astype(f32)        # (T*R, V)      row c -> relation (c % R)
    onehot = onehot_ref[...].astype(f32)    # (T*R, T)      row c -> one-hot(c // R)
    valid = valid_ref[...].astype(f32)      # (Bb, 1, H)    1.0 = valid history slot

    bb = seq.shape[0]

    # Expand target rows to the flattened (t, r) layout with a one-hot matmul
    # (standard TPU gather idiom).  The one-hot matrix is precomputed in the
    # wrapper, so no batch-invariant work is redone per grid step.  Kept in f32
    # so the gather is exact regardless of mxu_dtype.
    onehot_b = jnp.broadcast_to(onehot, (bb,) + onehot.shape)            # (Bb, TR, T)
    tgt_exp = jnp.einsum('bct,btv->bcv', onehot_b, tgt,
                         preferred_element_type=f32)                      # (Bb, TR, V)

    # ri_vectors: (r_vec + target_value) * target   (or r_vec * target)
    if include_val:
        ri = (rvec[None, :, :] + tv) * tgt_exp
    else:
        ri = rvec[None, :, :] * tgt_exp

    # attention[b, c, h] = sum_v ri[b, c, v] * seq[b, h, v]  -> one batched MXU op.
    scores = jnp.einsum('bcv,bhv->bch',
                        ri.astype(mxu_dtype), seq.astype(mxu_dtype),
                        preferred_element_type=f32)                       # (Bb, TR, H)

    # ---- target_attention: the t == 0 rows; softmax over R per history slot h.
    # (softmax is shift invariant, so torch's global max subtraction is a no-op)
    s0 = scores[:, 0:R, :]                                                # (Bb, R, H)
    m0 = jnp.max(s0, axis=1, keepdims=True)
    e0 = jnp.exp(s0 - m0)
    ta = e0 / jnp.sum(e0, axis=1, keepdims=True)
    ta_ref[...] = (ta * valid).astype(ta_ref.dtype)        # zero invalid slots

    # ---- masked softmax over the history axis H, for every (t, r) column.
    # where(valid, x, -inf) reproduces masked_fill exactly (including NaN rows
    # when a batch element has no valid history, matching the torch module).
    masked = jnp.where(valid > 0.0, scores, -jnp.inf)                     # (Bb, TR, H)
    m = jnp.max(masked, axis=2, keepdims=True)
    e = jnp.exp(masked - m)
    p = e / jnp.sum(e, axis=2, keepdims=True)                             # (Bb, TR, H)

    # context[b, c, v] = sum_h p[b, c, h] * seq[b, h, v]  -> one batched MXU op.
    ctx = jnp.einsum('bch,bhv->bcv',
                     p.astype(mxu_dtype), seq.astype(mxu_dtype),
                     preferred_element_type=f32)                          # (Bb, TR, V)
    ctx_ref[...] = ctx.astype(ctx_ref.dtype)


def _pick_batch_block(batch, T, R, V, H, out_elem_bytes, budget_bytes):
    """Largest batch block whose pipelined tiles + live temporaries fit the budget."""
    TR = T * R
    io_bytes = 4 * (H * V + T * V + TR * V + H) + out_elem_bytes * TR * V + 4 * R * H
    tmp_bytes = 4 * (5 * TR * V + 3 * TR * H)      # ri, tgt_exp, ctx, scores, e, p, ...
    per_b = 2 * io_bytes + tmp_bytes               # x2: double-buffered pipeline
    cap = max(1, budget_bytes // max(per_b, 1))
    divisors = [d for d in range(1, batch + 1) if batch % d == 0 and d <= cap] or [1]
    # Prefer >= 4 grid steps (keeps both v7x TensorCores busy and the DMA/compute
    # pipeline overlapped) as long as the dominant per-step stream stays large.
    preferred = [d for d in divisors
                 if batch // d >= 4 and d * TR * V * 4 >= 256 * 1024]
    return max(preferred) if preferred else max(divisors)


def relational_dynamic_aggregation(seq, target, target_value, valid_mask,
                                   relation_embedding, include_val=True, *,
                                   mxu_dtype=jnp.float32,
                                   out_dtype=jnp.float32):
    """Pallas implementation of RelationalDynamicAggregation.forward.

    Returns (context (B,T,R,V), target_attention (B,H,R)).
    mxu_dtype / out_dtype can be set to jnp.bfloat16 in production for higher
    MXU throughput and half the context writeback traffic.
    """
    B, H, V = seq.shape
    T = target.shape[1]
    R = relation_embedding.shape[0]
    TR = T * R

    # Per-generation VMEM sizing (v5e/v6e: 128 MiB, v7x: 64 MiB per TensorCore).
    try:
        vmem_physical = int(pltpu.get_tpu_info().vmem_capacity_bytes)
    except Exception:
        vmem_physical = 64 * 1024 * 1024           # conservative (v7x per-core size)
    vmem_limit = min(vmem_physical // 2, 64 * 1024 * 1024)
    block_budget = vmem_limit // 2                 # headroom for compiler scratch

    Bb = _pick_batch_block(B, T, R, V, H, jnp.dtype(out_dtype).itemsize, block_budget)
    n_steps = B // Bb

    # ---- batch-invariant expansion hoisted out of the kernel -----------------
    rvec_tiled = jnp.tile(relation_embedding.astype(jnp.float32), (T, 1))   # (TR, V)
    onehot_t = (jnp.arange(TR)[:, None] // R ==
                jnp.arange(T)[None, :]).astype(jnp.float32)                 # (TR, T)

    tv_flat = target_value.reshape(B, TR, V)                   # contiguous view
    valid = valid_mask.reshape(B, 1, H).astype(jnp.float32)    # tiny

    kernel = functools.partial(_rda_kernel, include_val=include_val,
                               n_relation=R, mxu_dtype=mxu_dtype)

    out_shapes = (
        jax.ShapeDtypeStruct((B, TR, V), out_dtype),     # context, (t, r) flattened
        jax.ShapeDtypeStruct((B, R, H), jnp.float32),    # target_attention (transposed)
    )

    ctx_flat, ta_t = pl.pallas_call(
        kernel,
        out_shape=out_shapes,
        grid_spec=pltpu.PrefetchScalarGridSpec(
            num_scalar_prefetch=0,
            grid=(n_steps,),
            in_specs=[
                # Constant-index inputs: fetched once (block index never changes).
                pl.BlockSpec((TR, V), lambda i: (0, 0)),          # tiled relation table
                pl.BlockSpec((TR, T), lambda i: (0, 0)),          # one-hot target gather
                # Batch-blocked streams (Bb elements per grid step).
                pl.BlockSpec((Bb, H, V), lambda i: (i, 0, 0)),    # seq
                pl.BlockSpec((Bb, T, V), lambda i: (i, 0, 0)),    # target
                pl.BlockSpec((Bb, TR, V), lambda i: (i, 0, 0)),   # target_value (flat)
                pl.BlockSpec((Bb, 1, H), lambda i: (i, 0, 0)),    # valid mask
            ],
            out_specs=[
                pl.BlockSpec((Bb, TR, V), lambda i: (i, 0, 0)),   # context slab
                pl.BlockSpec((Bb, R, H), lambda i: (i, 0, 0)),    # target_attention^T
            ],
        ),
        compiler_params=pltpu.CompilerParams(
            dimension_semantics=("parallel",),
            vmem_limit_bytes=vmem_limit),
    )(rvec_tiled, onehot_t, seq, target, tv_flat, valid)

    context = ctx_flat.reshape(B, T, R, V)
    target_attention = jnp.transpose(ta_t, (0, 2, 1))             # (B, H, R)
    return context, target_attention


def reference(seq, target, target_value, valid_mask, r_vectors, include_val, n_relation):
    """Pure-JAX transliteration of the PyTorch forward (for verification)."""
    if include_val:
        rv = r_vectors[None, None, :, :] + target_value
        ri = rv * target[:, :, None, :]
    else:
        ri = r_vectors[None, None, :, :] * target[:, :, None, :]
    attention = (seq[:, None, :, None, :] * ri[:, :, None, :, :]).sum(-1)     # (B,T,H,R)

    ta = attention[:, 0]
    ta = ta - ta.max()
    ta = jax.nn.softmax(ta, axis=-1)
    vm3 = jnp.tile(jnp.squeeze(valid_mask, axis=1), (1, 1, n_relation))       # (B,H,R)
    ta = jnp.where(vm3, ta, 0.0)

    att = attention - attention.max()
    att = jnp.where(valid_mask == 0, -jnp.inf, att)
    att = jax.nn.softmax(att, axis=-2)
    context = (seq[:, None, :, None, :] * att[:, :, :, :, None]).sum(-3)      # (B,T,R,V)
    return context, ta


if __name__ == "__main__":
    key = jax.random.PRNGKey(0)
    B, H, T, R, V = 2, 8, 3, 4, 32
    include_val = True

    k1, k2, k3, k4 = jax.random.split(key, 4)
    # Deterministic synthetic "nn.Embedding(n_relation, V)" weight.
    relation_embedding = jax.random.normal(k1, (R, V), jnp.float32)
    seq = jax.random.normal(k2, (B, H, V), jnp.float32)
    target = jax.random.normal(k3, (B, T, V), jnp.float32)
    target_value = jax.random.normal(k4, (B, T, R, V), jnp.float32)
    lengths = jnp.array([5, 8])
    valid_mask = (jnp.arange(H)[None, :] < lengths[:, None]).reshape(B, 1, H, 1)  # bool

    # ---- exact path (f32 MXU, f32 outputs): must match the reference tightly.
    context, target_attention = relational_dynamic_aggregation(
        seq, target, target_value, valid_mask, relation_embedding, include_val)
    jax.block_until_ready((context, target_attention))

    ref_ctx, ref_ta = reference(seq, target, target_value, valid_mask,
                                relation_embedding, include_val, R)
    assert context.shape == (B, T, R, V) and target_attention.shape == (B, H, R)
    assert jnp.allclose(context, ref_ctx, atol=2e-3, rtol=2e-3), \
        float(jnp.max(jnp.abs(context - ref_ctx)))
    assert jnp.allclose(target_attention, ref_ta, atol=2e-3, rtol=2e-3), \
        float(jnp.max(jnp.abs(target_attention - ref_ta)))

    # ---- reduced-precision production path (bf16 MXU operands + bf16 context
    # output, per perf review).  bf16 attention logits carry ~1e-2-level error,
    # so this is only a coarse sanity check.
    ctx_bf16, ta_bf16 = relational_dynamic_aggregation(
        seq, target, target_value, valid_mask, relation_embedding, include_val,
        mxu_dtype=jnp.bfloat16, out_dtype=jnp.bfloat16)
    jax.block_until_ready((ctx_bf16, ta_bf16))
    assert bool(jnp.isfinite(ctx_bf16.astype(jnp.float32)).all())
    assert bool(jnp.isfinite(ta_bf16).all())
    assert float(jnp.max(jnp.abs(ctx_bf16.astype(jnp.float32) - ref_ctx))) < 0.5
    assert float(jnp.max(jnp.abs(ta_bf16 - ref_ta))) < 0.25

    print("KERNEL_OK")
</pallas_src>

<mosaic_0001>
module attributes {stable_mosaic.version = 11 : i64} {
  func.func @_rda_kernel(%arg0: i32, %arg1: memref<12x32xf32, #tpu.memory_space<vmem>>, %arg2: memref<12x3xf32, #tpu.memory_space<vmem>>, %arg3: memref<2x8x32xf32, #tpu.memory_space<vmem>>, %arg4: memref<2x3x32xf32, #tpu.memory_space<vmem>>, %arg5: memref<2x12x32xf32, #tpu.memory_space<vmem>>, %arg6: memref<2x1x8xf32, #tpu.memory_space<vmem>>, %arg7: memref<2x12x32xf32, #tpu.memory_space<vmem>>, %arg8: memref<2x4x8xf32, #tpu.memory_space<vmem>>) attributes {dimension_semantics = [#tpu.dimension_semantics<parallel>], iteration_bounds = array<i64: 1>, scalar_prefetch = 0 : i64, scratch_operands = 0 : i64, tpu.core_type = #tpu.core_type<tc>, window_params = [{pipeline_mode = #tpu.pipeline_mode<synchronous>, transform_indices = @transform_0, window_bounds = array<i64: 12, 32>}, {pipeline_mode = #tpu.pipeline_mode<synchronous>, transform_indices = @transform_1, window_bounds = array<i64: 12, 3>}, {transform_indices = @transform_2, window_bounds = array<i64: 2, 8, 32>}, {transform_indices = @transform_3, window_bounds = array<i64: 2, 3, 32>}, {transform_indices = @transform_4, window_bounds = array<i64: 2, 12, 32>}, {transform_indices = @transform_5, window_bounds = array<i64: 2, 1, 8>}, {transform_indices = @transform_6, window_bounds = array<i64: 2, 12, 32>}, {transform_indices = @transform_7, window_bounds = array<i64: 2, 4, 8>}]} {
    %c0 = arith.constant 0 : index
    %c0_0 = arith.constant 0 : index
    %c0_1 = arith.constant 0 : index
    %0 = vector.load %arg3[%c0, %c0_0, %c0_1] : memref<2x8x32xf32, #tpu.memory_space<vmem>>, vector<2x8x32xf32>
    %c0_2 = arith.constant 0 : index
    %c0_3 = arith.constant 0 : index
    %c0_4 = arith.constant 0 : index
    %1 = vector.load %arg4[%c0_2, %c0_3, %c0_4] : memref<2x3x32xf32, #tpu.memory_space<vmem>>, vector<2x3x32xf32>
    %c0_5 = arith.constant 0 : index
    %c0_6 = arith.constant 0 : index
    %c0_7 = arith.constant 0 : index
    %2 = vector.load %arg5[%c0_5, %c0_6, %c0_7] : memref<2x12x32xf32, #tpu.memory_space<vmem>>, vector<2x12x32xf32>
    %c0_8 = arith.constant 0 : index
    %c0_9 = arith.constant 0 : index
    %3 = vector.load %arg1[%c0_8, %c0_9] : memref<12x32xf32, #tpu.memory_space<vmem>>, vector<12x32xf32>
    %c0_10 = arith.constant 0 : index
    %c0_11 = arith.constant 0 : index
    %4 = vector.load %arg2[%c0_10, %c0_11] : memref<12x3xf32, #tpu.memory_space<vmem>>, vector<12x3xf32>
    %c0_12 = arith.constant 0 : index
    %c0_13 = arith.constant 0 : index
    %c0_14 = arith.constant 0 : index
    %5 = vector.load %arg6[%c0_12, %c0_13, %c0_14] : memref<2x1x8xf32, #tpu.memory_space<vmem>>, vector<2x1x8xf32>
    %6 = vector.shape_cast %4 : vector<12x3xf32> to vector<1x12x3xf32>
    %7 = vector.broadcast %6 : vector<1x12x3xf32> to vector<2x12x3xf32>
    "tpu.trace_start"() <{level = 10 : i32, message = "bct,btv->bcv"}> : () -> ()
    %cst = arith.constant dense<0.000000e+00> : vector<2x12x32xf32>
    %8 = tpu.matmul %7, %1, %cst {dimension_numbers = #tpu.dot_dimension_numbers<[2], [1], [1], [2], [0, 0, 0, 1, 1, 2], [0], [0]>} : vector<2x12x3xf32>, vector<2x3x32xf32>, vector<2x12x32xf32> -> vector<2x12x32xf32>
    "tpu.trace_stop"() : () -> ()
    %9 = vector.shape_cast %3 : vector<12x32xf32> to vector<1x12x32xf32>
    %10 = vector.broadcast %9 : vector<1x12x32xf32> to vector<2x12x32xf32>
    %11 = arith.addf %10, %2 : vector<2x12x32xf32>
    %12 = arith.mulf %11, %8 : vector<2x12x32xf32>
    "tpu.trace_start"() <{level = 10 : i32, message = "bcv,bhv->bch"}> : () -> ()
    %cst_15 = arith.constant dense<0.000000e+00> : vector<2x12x8xf32>
    %13 = tpu.matmul %12, %0, %cst_15 {dimension_numbers = #tpu.dot_dimension_numbers<[2], [2], [1], [1], [0, 0, 0, 1, 1, 1], [0], [0]>} : vector<2x12x32xf32>, vector<2x8x32xf32>, vector<2x12x8xf32> -> vector<2x12x8xf32>
    "tpu.trace_stop"() : () -> ()
    %14 = vector.extract_strided_slice %13 {offsets = [0, 0, 0], sizes = [2, 4, 8], strides = [1, 1, 1]} : vector<2x12x8xf32> to vector<2x4x8xf32>
    %cst_16 = arith.constant dense<0xFF800000> : vector<2x8xf32>
    %15 = vector.multi_reduction <maximumf>, %14, %cst_16 [1] : vector<2x4x8xf32> to vector<2x8xf32>
    %16 = vector.shape_cast %15 : vector<2x8xf32> to vector<2x1x8xf32>
    %17 = vector.broadcast %16 : vector<2x1x8xf32> to vector<2x4x8xf32>
    %18 = arith.subf %14, %17 : vector<2x4x8xf32>
    %19 = math.exp %18 : vector<2x4x8xf32>
    %cst_17 = arith.constant dense<0.000000e+00> : vector<2x8xf32>
    %20 = vector.multi_reduction <add>, %19, %cst_17 [1] : vector<2x4x8xf32> to vector<2x8xf32>
    %21 = vector.shape_cast %20 : vector<2x8xf32> to vector<2x1x8xf32>
    %22 = vector.broadcast %21 : vector<2x1x8xf32> to vector<2x4x8xf32>
    %23 = arith.divf %19, %22 : vector<2x4x8xf32>
    %24 = vector.broadcast %5 : vector<2x1x8xf32> to vector<2x4x8xf32>
    %25 = arith.mulf %23, %24 : vector<2x4x8xf32>
    %c0_18 = arith.constant 0 : index
    %c0_19 = arith.constant 0 : index
    %c0_20 = arith.constant 0 : index
    %26 = vector.load %arg8[%c0_18, %c0_19, %c0_20] : memref<2x4x8xf32, #tpu.memory_space<vmem>>, vector<2x4x8xf32>
    tpu.vector_store %arg8[%c0_18, %c0_19, %c0_20], %25 {strides = array<i32>} : memref<2x4x8xf32, #tpu.memory_space<vmem>>, vector<2x4x8xf32>,
    %cst_21 = arith.constant 0.000000e+00 : f32
    %27 = vector.broadcast %cst_21 : f32 to vector<2x1x8xf32>
    %28 = arith.cmpf ogt, %5, %27 : vector<2x1x8xf32>
    %cst_22 = arith.constant 0xFF800000 : f32
    %29 = vector.shape_cast %28 : vector<2x1x8xi1> to vector<2x1x8xi1>
    %30 = vector.broadcast %29 : vector<2x1x8xi1> to vector<2x12x8xi1>
    %31 = vector.broadcast %cst_22 : f32 to vector<2x12x8xf32>
    %32 = arith.select %30, %13, %31 : vector<2x12x8xi1>, vector<2x12x8xf32>
    %cst_23 = arith.constant dense<0xFF800000> : vector<2x12xf32>
    %33 = vector.multi_reduction <maximumf>, %32, %cst_23 [2] : vector<2x12x8xf32> to vector<2x12xf32>
    %34 = vector.shape_cast %33 : vector<2x12xf32> to vector<2x12x1xf32>
    %35 = vector.broadcast %34 : vector<2x12x1xf32> to vector<2x12x8xf32>
    %36 = arith.subf %32, %35 : vector<2x12x8xf32>
    %37 = math.exp %36 : vector<2x12x8xf32>
    %cst_24 = arith.constant dense<0.000000e+00> : vector<2x12xf32>
    %38 = vector.multi_reduction <add>, %37, %cst_24 [2] : vector<2x12x8xf32> to vector<2x12xf32>
    %39 = vector.shape_cast %38 : vector<2x12xf32> to vector<2x12x1xf32>
    %40 = vector.broadcast %39 : vector<2x12x1xf32> to vector<2x12x8xf32>
    %41 = arith.divf %37, %40 : vector<2x12x8xf32>
    "tpu.trace_start"() <{level = 10 : i32, message = "bch,bhv->bcv"}> : () -> ()
    %cst_25 = arith.constant dense<0.000000e+00> : vector<2x12x32xf32>
    %42 = tpu.matmul %41, %0, %cst_25 {dimension_numbers = #tpu.dot_dimension_numbers<[2], [1], [1], [2], [0, 0, 0, 1, 1, 2], [0], [0]>} : vector<2x12x8xf32>, vector<2x8x32xf32>, vector<2x12x32xf32> -> vector<2x12x32xf32>
    "tpu.trace_stop"() : () -> ()
    %c0_26 = arith.constant 0 : index
    %c0_27 = arith.constant 0 : index
    %c0_28 = arith.constant 0 : index
    %43 = vector.load %arg7[%c0_26, %c0_27, %c0_28] : memref<2x12x32xf32, #tpu.memory_space<vmem>>, vector<2x12x32xf32>
    tpu.vector_store %arg7[%c0_26, %c0_27, %c0_28], %42 {strides = array<i32>} : memref<2x12x32xf32, #tpu.memory_space<vmem>>, vector<2x12x32xf32>,
    return
  }
  func.func @transform_0(%arg0: i32) -> (i32, i32) {
    %c0_i32 = arith.constant 0 : i32
    %c0_i32_0 = arith.constant 0 : i32
    %c0_i32_1 = arith.constant 0 : i32
    return %c0_i32, %c0_i32_0 : i32, i32
  }
  func.func @transform_1(%arg0: i32) -> (i32, i32) {
    %c0_i32 = arith.constant 0 : i32
    %c0_i32_0 = arith.constant 0 : i32
    %c0_i32_1 = arith.constant 0 : i32
    return %c0_i32, %c0_i32_0 : i32, i32
  }
  func.func @transform_2(%arg0: i32) -> (i32, i32, i32) {
    %c0_i32 = arith.constant 0 : i32
    %c0_i32_0 = arith.constant 0 : i32
    %c0_i32_1 = arith.constant 0 : i32
    return %arg0, %c0_i32, %c0_i32_0 : i32, i32, i32
  }
  func.func @transform_3(%arg0: i32) -> (i32, i32, i32) {
    %c0_i32 = arith.constant 0 : i32
    %c0_i32_0 = arith.constant 0 : i32
    %c0_i32_1 = arith.constant 0 : i32
    return %arg0, %c0_i32, %c0_i32_0 : i32, i32, i32
  }
  func.func @transform_4(%arg0: i32) -> (i32, i32, i32) {
    %c0_i32 = arith.constant 0 : i32
    %c0_i32_0 = arith.constant 0 : i32
    %c0_i32_1 = arith.constant 0 : i32
    return %arg0, %c0_i32, %c0_i32_0 : i32, i32, i32
  }
  func.func @transform_5(%arg0: i32) -> (i32, i32, i32) {
    %c0_i32 = arith.constant 0 : i32
    %c0_i32_0 = arith.constant 0 : i32
    %c0_i32_1 = arith.constant 0 : i32
    return %arg0, %c0_i32, %c0_i32_0 : i32, i32, i32
  }
  func.func @transform_6(%arg0: i32) -> (i32, i32, i32) {
    %c0_i32 = arith.constant 0 : i32
    %c0_i32_0 = arith.constant 0 : i32
    %c0_i32_1 = arith.constant 0 : i32
    return %arg0, %c0_i32, %c0_i32_0 : i32, i32, i32
  }
  func.func @transform_7(%arg0: i32) -> (i32, i32, i32) {
    %c0_i32 = arith.constant 0 : i32
    %c0_i32_0 = arith.constant 0 : i32
    %c0_i32_1 = arith.constant 0 : i32
    return %arg0, %c0_i32, %c0_i32_0 : i32, i32, i32
  }
}

</mosaic_0001>

<bundles_post_ra>
// kernel: tpu_custom_call.1
= control target key start
LH: loop header
LB: loop body
LE: loop exit
PB: predicated region body
PF: predicated region fallthrough
CT: control target
= control target key end

     0   :  { %vm47_vm0 = vcmask 1042432   ;;  %vm40_vm1 = vcmask 23552   ;;  %s954_s0 = inlined_call_operand.vmem [shape: f32[12,32], index: 0, kind: input, shape index: {}]   ;;  %s955_s1 = inlined_call_operand.vmem [shape: f32[12,3], index: 1, kind: input, shape index: {}]   ;;  %s956_s2 = inlined_call_operand.vmem [shape: f32[2,8,32], index: 2, kind: input, shape index: {}]   ;;  %s957_s3 = inlined_call_operand.vmem [shape: f32[2,3,32], index: 3, kind: input, shape index: {}]   ;;  %s958_s4 = inlined_call_operand.vmem [shape: f32[2,12,32], index: 4, kind: input, shape index: {}]   ;;  %s959_s5 = inlined_call_operand.vmem [shape: f32[2,1,8], index: 5, kind: input, shape index: {}]   ;;  %s960_s6 = inlined_call_operand.vmem [shape: f32[2,12,32], index: 6, kind: output, shape index: {0}]   ;;  %s961_s7 = inlined_call_operand.hbm [shape: f32[2,4,8], index: 7, kind: output, shape index: {1}]  }
   0x1   :  { %v28_v0 = vld [vmem:[%s957_s3] sm:$0x7]  ;;  %v29_v1 = vld [vmem:[%s957_s3 + $0x4] sm:$0x7]  ;;  %v37_v3 = vld [vmem:[%s955_s1 + $0x8] sm:$0xf] }
   0x2   :  { %v36_v2 = vld [vmem:[%s955_s1] sm:$0xff]  ;;  %720 = vmatprep.subr.msk.mxu0 %vm47_vm0, %v28_v0  ;;  %725 = vmatprep.subr.msk.mxu1 %vm47_vm0, %v29_v1 }
   0x3   :  { %721 = vmatpush3.msk.msra.mxu0 %vm47_vm0, %v28_v0  ;;  %722 = vmatprep.mubr.msk.f32.mxu0 %vm40_vm1, %v36_v2 }
   0x4   :  { %13 = vsyncpa [#allocation3], 0  ;;  %726 = vmatpush3.msk.msra.mxu1 %vm47_vm0, %v29_v1  ;;  %727 = vmatprep.mubr.msk.f32.mxu1 %vm40_vm1, %v36_v2  ;;  %v26_v4 = vld [vmem:[%s956_s2] sm:$0xff]  ;;  %vm212_vm2 = vcmask 261120   ;;  %v27_v5 = vld [vmem:[%s956_s2 + $0x8] sm:$0xff]  ;;  %v422_v24 = vlaneseq  ;;  %v800_v30 = vmov 0  }
   0x5   :  { %723 = vmatmul.mubr.msk.f32.vlgmr.msra.gmra.mxu0 %vm40_vm1, %v37_v3  ;;  %728 = vmatmul.mubr.msk.f32.vlgmr.msra.gmra.mxu1 %vm40_vm1, %v37_v3  ;;  %v33_v6 = vld [vmem:[%s958_s4 + $0x18] sm:$0xf]  ;;  %v30_v7 = vld [vmem:[%s958_s4] sm:$0xff]  ;;  %v32_v9 = vld [vmem:[%s958_s4 + $0x10] sm:$0xff]  ;;  %vm381_vm6 = vcmask 60416   ;;  %vm454_vm8 = vcmask 64512  }
   0x6   :  { %730 = vmatprep.subr.msk.mxu0 %vm212_vm2, %v26_v4  ;;  %735 = vmatprep.subr.msk.mxu1 %vm212_vm2, %v27_v5  ;;  %v34_v8 = vld [vmem:[%s954_s0] sm:$0xff]  ;;  %v31_v10 = vld [vmem:[%s958_s4 + $0x8] sm:$0xf]  ;;  %v423_v25 = vshrl.u32 %v422_v24, 7 }
   0x7   :  { %731 = vmatpush3.xpose.msk.msra.mxu0 %vm212_vm2, %v26_v4  ;;  %736 = vmatpush3.xpose.msk.msra.mxu1 %vm212_vm2, %v27_v5  ;;  %v35_v11 = vld [vmem:[%s954_s0 + $0x8] sm:$0xf]  ;;  %v204_v13 = vadd.f32 %v34_v8, %v30_v7  ;;  %v206_v14 = vadd.f32 %v34_v8, %v32_v9  ;;  %v893_v27 = vld [vmem:[%s959_s5] sm:$0x1]  ;;  %v900_v29 = vld [vmem:[%s959_s5 + $0x1] sm:$0x1] }
   0x8   :  { %740 = vmatprep.subr.mxu0 %v26_v4  ;;  %745 = vmatprep.subr.mxu1 %v27_v5  ;;  %v207_v12 = vadd.f32 %v35_v11, %v33_v6  ;;  %v205_v16 = vadd.f32 %v35_v11, %v31_v10  ;;  %v888_v26 = vsub.s32 0, %v423_v25  ;;  %vm436_vm3 = vcmp.gt.f32.partialorder %v893_v27, 0.0  ;;  %s801_s5 = smov [#allocation2]  }
   0x9   :  { %vm437_vm4 = vcmp.gt.f32.partialorder %v900_v29, 0.0  ;;  %v438_v31 = vsel %vm436_vm3, 1, %v800_v30  ;;  %s673_s24 = sshll.u32 %s801_s5, 4  ;;  %s674_s24 = int_to_ptr.vmem [resolvable:$true] %s673_s24 }
   0xa   :  { %v425_v28 = vrot.slane %v893_v27, %v888_v26  ;;  %v439_v32 = vsel %vm437_vm4, 1, %v800_v30  ;;  %v443_v33 = vrot.slane %v438_v31, %v888_v26  ;;  %s778_s25 = scalar_lea.vmem %s674_s24, 128  ;;  %p783_p1 = scmp.lt.s32.totalorder %s674_s24, %s674_s24 }
   0xb   :  { %v447_v34 = vrot.slane %v439_v32, %v888_v26  ;;  %p779_p0 = scmp.ne.s32.totalorder %s674_s24, %s778_s25  ;;  %p784_p2 = scmp.lt.s32.totalorder %s778_s25, %s778_s25 }
   0xc   :  { %vm448_vm5 = vcmp.eq.s32.totalorder %v443_v33, 1 }
   0xd   :  { %vm449_vm7 = vcmp.eq.s32.totalorder %v447_v34, 1  ;;  %p785_p3 = por %p784_p2, %p783_p1 }
   0xf   :  { %p786_p4 = pnand %p785_p3, %p779_p0 }
  0xc5   :  { %v724_v15 = vpop.f32.mrf.mxu0  ;;  %v729_v17 = vpop.f32.mrf.mxu1 }
  0xc6   :  { %v211_v18 = vmul.f32 %v729_v17, %v207_v12  ;;  %v209_v23 = vmul.f32 %v724_v15, %v205_v16 }
  0xc7   :  { %v117_v19 = vpop.f32.mrf.mxu0  ;;  %v195_v20 = vpop.f32.mrf.mxu1 }
  0xc8   :  { %v208_v21 = vmul.f32 %v204_v13, %v117_v19  ;;  %v210_v22 = vmul.f32 %v206_v14, %v195_v20 }
  0xca   :  { %732 = vmatprep.mubr.msk.f32.mxu0 %vm212_vm2, %v208_v21  ;;  %737 = vmatprep.mubr.msk.f32.mxu1 %vm212_vm2, %v210_v22 }
  0xcb   :  { %733 = vmatmul.mubr.msk.f32.vlgmr.msra.gmra.mxu0 %vm212_vm2, %v209_v23  ;;  %738 = vmatmul.mubr.msk.f32.vlgmr.msra.gmra.mxu1 %vm212_vm2, %v211_v18  ;;  %v429_v18 = vrot.slane %v900_v29, %v888_v26 }
  0xcc   :  { %741 = vmatpush3.msra.mxu0 %v26_v4  ;;  %746 = vmatpush3.msra.mxu1 %v27_v5 }
 0x18b   :  { %v734_v35 = vpop.f32.mrf.mxu0  ;;  %v739_v36 = vpop.f32.mrf.mxu1 }
 0x18c   :  { %v906_v37 = vsel %vm448_vm5, %v734_v35, -inf  ;;  %v910_v41 = vsel %vm449_vm7, %v739_v36, -inf }
 0x18d   :  { %v288_v38 = vpop.f32.mrf.mxu0  ;;  %v372_v39 = vpop.f32.mrf.mxu1  ;;  %v458_v40 = vsel %vm381_vm6, %v906_v37, -inf  ;;  %v464_v51 = vsel %vm381_vm6, %v910_v41, -inf }
 0x18e   :  { %v382_v42 = vsel %vm381_vm6, %v288_v38, -inf  ;;  %v389_v43 = vsel %vm381_vm6, %v372_v39, -inf  ;;  %459 = vmax.xlane.f32.xlu1 %v458_v40  ;;  %v450_v44 = vsel %vm448_vm5, %v288_v38, -inf  ;;  %v452_v48 = vsel %vm449_vm7, %v372_v39, -inf }
 0x18f   :  { %v383_v45 = vrot.slane %v382_v42, 4  ;;  %v390_v46 = vrot.slane %v389_v43, 4  ;;  %v455_v47 = vsel %vm454_vm8, %v450_v44, -inf  ;;  %v461_v54 = vsel %vm454_vm8, %v452_v48, -inf }
 0x190   :  { %456 = vmax.xlane.f32.xlu0 %v455_v47 }
 0x191   :  { %v384_v49 = vmax.f32 %v382_v42, %v383_v45  ;;  %v391_v50 = vmax.f32 %v389_v43, %v390_v46 }
 0x192   :  { %465 = vmax.xlane.f32.xlu1 %v464_v51 }
 0x193   :  { %v385_v52 = vrot.slane %v384_v49, 2  ;;  %v392_v53 = vrot.slane %v391_v50, 2 }
 0x194   :  { %462 = vmax.xlane.f32.xlu0 %v461_v54 }
 0x195   :  { %v386_v55 = vmax.f32 %v384_v49, %v385_v52  ;;  %v393_v56 = vmax.f32 %v391_v50, %v392_v53 }
 0x197   :  { %v387_v57 = vrot.slane %v386_v55, 1  ;;  %v394_v58 = vrot.slane %v393_v56, 1 }
 0x199   :  { %v388_v59 = vmax.f32 %v386_v55, %v387_v57  ;;  %v395_v60 = vmax.f32 %v393_v56, %v394_v58 }
 0x19b   :  { %v396_v61 = vsub.f32 %v288_v38, %v388_v59  ;;  %v397_v62 = vsub.f32 %v372_v39, %v395_v60 }
 0x19d   :  { %v398_v63 = vmul.f32 1.442695, %v396_v61  ;;  %v400_v0 = vmul.f32 1.442695, %v397_v62 }
 0x19f   :  { %754 = vpow2.f32 %v398_v63 }
 0x1a0   :  { %756 = vpow2.f32 %v400_v0 }
 0x1ac   :  { %v755_v1 = vpop.eup %754 }
 0x1ad   :  { %v757_v2 = vpop.eup %756  ;;  %v402_v3 = vsel %vm381_vm6, %v755_v1, 0.0 }
 0x1ae   :  { %v403_v4 = vrot.slane %v402_v3, 4  ;;  %v409_v5 = vsel %vm381_vm6, %v757_v2, 0.0 }
 0x1af   :  { %v410_v6 = vrot.slane %v409_v5, 4 }
 0x1b0   :  { %v404_v7 = vadd.f32 %v403_v4, %v402_v3 }
 0x1b1   :  { %v411_v8 = vadd.f32 %v410_v6, %v409_v5 }
 0x1b2   :  { %v405_v9 = vrot.slane %v404_v7, 2 }
 0x1b3   :  { %v412_v10 = vrot.slane %v411_v8, 2 }
 0x1b4   :  { %v406_v11 = vadd.f32 %v405_v9, %v404_v7 }
 0x1b5   :  { %v413_v12 = vadd.f32 %v412_v10, %v411_v8 }
 0x1b6   :  { %v407_v13 = vrot.slane %v406_v11, 1 }
 0x1b7   :  { %v414_v14 = vrot.slane %v413_v12, 1 }
 0x1b8   :  { %v408_v15 = vadd.f32 %v407_v13, %v406_v11 }
 0x1b9   :  { %v415_v16 = vadd.f32 %v414_v14, %v413_v12 }
 0x1ba   :  { %758 = vrcp.f32 %v408_v15 }
 0x1bb   :  { %760 = vrcp.f32 %v415_v16 }
 0x1c7   :  { %v759_v17 = vpop.eup %758 }
 0x1c8   :  { %v761_v19 = vpop.eup %760  ;;  %v417_v20 = vmul.f32 %v759_v17, %v755_v1 }
 0x1c9   :  { %v419_v21 = vmul.f32 %v761_v19, %v757_v2 }
 0x1ca   :  { %v432_v22 = vmul.f32 %v425_v28, %v417_v20 }
 0x1cb   :  { %v433_v23 = vmul.f32 %v429_v18, %v419_v21 }
 0x1cc   :  { %434 = vst.msk [vmem:[#allocation2] sm:$0xf] %vm381_vm6, %v432_v22 }
 0x1cd   :  { %435 = vst.msk [vmem:[#allocation2 + $0x4] sm:$0xf] %vm381_vm6, %v433_v23 }
 0x217   :  { %v460_v24 = vpop.xlane.xlu1 %459 }
 0x218   :  { %v468_v25 = vsub.f32 %v906_v37, %v460_v24 }
 0x219   :  { %v457_v30 = vpop.xlane.xlu0 %456 }
 0x21a   :  { %v467_v31 = vsub.f32 %v450_v44, %v457_v30  ;;  %v473_v33 = vmul.f32 1.442695, %v468_v25 }
 0x21b   :  { %v466_v32 = vpop.xlane.xlu1 %465 }
 0x21c   :  { %v471_v29 = vmul.f32 1.442695, %v467_v31  ;;  %v470_v34 = vsub.f32 %v910_v41, %v466_v32 }
 0x21d   :  { %v463_v35 = vpop.xlane.xlu0 %462 }
 0x21e   :  { %762 = vpow2.f32 %v471_v29  ;;  %v469_v36 = vsub.f32 %v452_v48, %v463_v35  ;;  %v477_v26 = vmul.f32 1.442695, %v470_v34 }
 0x21f   :  { %764 = vpow2.f32 %v473_v33 }
 0x220   :  { %v475_v27 = vmul.f32 1.442695, %v469_v36 }
 0x222   :  { %766 = vpow2.f32 %v475_v27 }
 0x223   :  { %768 = vpow2.f32 %v477_v26 }
 0x22b   :  { %v763_v28 = vpop.eup %762 }
 0x22c   :  { %v479_v38 = vsel %vm454_vm8, %v763_v28, 0.0  ;;  %v765_v39 = vpop.eup %764 }
 0x22d   :  { %480 = vadd.xlane.f32.xlu0 %v479_v38  ;;  %v482_v40 = vsel %vm381_vm6, %v765_v39, 0.0 }
 0x22f   :  { %v767_v37 = vpop.eup %766 }
 0x230   :  { %v485_v42 = vsel %vm454_vm8, %v767_v37, 0.0  ;;  %v769_v43 = vpop.eup %768 }
 0x231   :  { %483 = vadd.xlane.f32.xlu0 %v482_v40  ;;  %486 = vadd.xlane.f32.xlu1 %v485_v42  ;;  %v488_v41 = vsel %vm381_vm6, %v769_v43, 0.0 }
 0x235   :  { %489 = vadd.xlane.f32.xlu1 %v488_v41 }
 0x2b6   :  { %v481_v44 = vpop.xlane.xlu0 %480 }
 0x2b7   :  { %770 = vrcp.f32 %v481_v44 }
 0x2ba   :  { %v487_v45 = vpop.xlane.xlu1 %486  ;;  %v484_v46 = vpop.xlane.xlu0 %483 }
 0x2bb   :  { %772 = vrcp.f32 %v487_v45 }
 0x2bc   :  { %774 = vrcp.f32 %v484_v46 }
 0x2be   :  { %v490_v47 = vpop.xlane.xlu1 %489 }
 0x2bf   :  { %776 = vrcp.f32 %v490_v47 }
 0x2c4   :  { %v771_v48 = vpop.eup %770 }
 0x2c5   :  { %v492_v49 = vmul.f32 %v771_v48, %v763_v28 }
 0x2c7   :  { %742 = vmatprep.mubr.msk.f32.mxu0 %vm454_vm8, %v492_v49 }
 0x2c8   :  { %v773_v50 = vpop.eup %772 }
 0x2c9   :  { %v775_v51 = vpop.eup %774  ;;  %v496_v52 = vmul.f32 %v773_v50, %v767_v37 }
 0x2ca   :  { %v494_v53 = vmul.f32 %v775_v51, %v765_v39 }
 0x2cb   :  { %747 = vmatprep.mubr.msk.f32.mxu1 %vm454_vm8, %v496_v52 }
 0x2cc   :  { %v777_v54 = vpop.eup %776  ;;  %743 = vmatmul.mubr.msk.f32.vlgmr.msra.gmra.mxu0 %vm454_vm8, %v494_v53 }
 0x2cd   :  { %v498_v55 = vmul.f32 %v777_v54, %v769_v43 }
 0x2cf   :  { %748 = vmatmul.mubr.msk.f32.vlgmr.msra.gmra.mxu1 %vm454_vm8, %v498_v55 }
 0x2d0   :  { %789 = shalt.err (!%p786_p4)
}
 0x2d1   :  { %s802_s26 = smov 64   ;;  %s803_s27 = smov 4   ;;  %vm662_vm9 = vcmask 257024  }
 0x2d2   :  { %679 = dma.vmem_to_hbm [thread:$0]  %s674_s24, 128, %s961_s7, [#allocation3], %s802_s26, %s802_s26, %s803_s27  }
 0x38c   :  { %v744_v56 = vpop.f32.mrf.mxu0 }
 0x38d   :  { %663 = vst.msk [vmem:[%s960_s6 + $0x8] sm:$0xf] %vm662_vm9, %v744_v56 }
 0x38e   :  { %v571_v57 = vpop.f32.mrf.mxu0 }
 0x38f   :  { %661 = vst.msk [vmem:[%s960_s6] sm:$0xff] %vm212_vm2, %v571_v57  ;;  %v749_v58 = vpop.f32.mrf.mxu1 }
 0x390   :  { %665 = vst.msk [vmem:[%s960_s6 + $0x18] sm:$0xf] %vm662_vm9, %v749_v58 }
 0x391   :  { %v652_v59 = vpop.f32.mrf.mxu1 }
 0x392   :  { %664 = vst.msk [vmem:[%s960_s6 + $0x10] sm:$0xff] %vm212_vm2, %v652_v59 }
 0x393   :  { %798 = dma.done.wait [#allocation3], 128  }
 0x394   :  { %799 = vsyncadd [#allocation3], 4294967168 }
 0x395   :  { %685 = vsyncpa [#allocation3], 1 }

</bundles_post_ra>
